<compile_context>
chip_gen: v6e
topology: v6e:2x2x1
jax: 0.10.0
libtpu: 0.0.40
codegen_flags: <defaults>
</compile_context>

<pallas_src>
import jax
import jax.numpy as jnp
from jax.experimental import pallas as pl
from jax.experimental.pallas import tpu as pltpu

B, S, D, H, HV = 2, 8, 32, 64, 32        # batch, seq, hidden, mlp-hidden, value-hidden
NUC_VOCAB, CIG_VOCAB = 16, 8
NH = HV + 2                              # head output width: [alpha | beta | value-hidden]
LANES = 128

# packed constant-slab row offsets (all vreg-aligned multiples of 8)
W1_OFF, W2_OFF, WH_OFF, WF_OFF, BIAS_OFF = 0, 128, 256, 512, 640
SLAB_ROWS = 648
DIN_ROWS = 16            # rows 0:B -> selected embedding rows, rows 8:8+B -> ref embedding


def _vmem():
    return pl.BlockSpec(memory_space=pltpu.MemorySpace.VMEM)


def _softplus(x):
    # stable one-exp softplus.  (log1p would be marginally more accurate for
    # large |x| but log(1+e) is guaranteed to lower and is within tolerance.)
    return jnp.maximum(x, 0.0) + jnp.log(1.0 + jnp.exp(-jnp.abs(x)))


# ------------------------------ fused kernel -------------------------------

def qnet_kernel(din_ref, w_ref, q_ref):
    """Fused: residual MLP backbone (on the pre-selected mut rows) -> fused
    Beta-classifier + value head -> alpha_beta_to_q.  Two input slabs, one
    lane-dense output store; everything stays in VMEM/vregs."""
    x = din_ref[0:8, :]                       # [8,128] selected embedding rows (0:B real)
    re = din_ref[8:16, :]                     # [8,128] reference embedding rows (0:B real)

    # static slices of the single packed constant slab
    w1 = w_ref[W1_OFF:W1_OFF + 128, :]        # [128,128]  (real [D,H])
    w2 = w_ref[W2_OFF:W2_OFF + 128, :]        # [128,128]  (real [H,D])
    wh = w_ref[WH_OFF:WH_OFF + 256, :]        # [256,128]  fused head weights
    wf = w_ref[WF_OFF:WF_OFF + 128, :]        # [128,128]  wv2 broadcast to all lanes
    b1 = w_ref[BIAS_OFF + 0:BIAS_OFF + 1, :]  # [1,128]
    b2 = w_ref[BIAS_OFF + 1:BIAS_OFF + 2, :]
    bh = w_ref[BIAS_OFF + 2:BIAS_OFF + 3, :]  # [ba | bb | bv1 | 0...]
    bf = w_ref[BIAS_OFF + 3:BIAS_OFF + 4, :]  # bv2 in every lane

    # ---- backbone (position-wise residual MLP) on the selected rows only ----
    h1 = jnp.maximum(jnp.dot(x, w1, preferred_element_type=jnp.float32) + b1, 0.0)
    h = x + jnp.dot(h1, w2, preferred_element_type=jnp.float32) + b2       # [8,128]

    # ---- fused heads: one [8,256] @ [256,128] dot over [h_sel | ref_e] ----
    hcat = jnp.concatenate([h, re], axis=-1)                               # [8,256]
    zh = jnp.dot(hcat, wh, preferred_element_type=jnp.float32) + bh        # [8,128]
    # lane 0 = alpha pre-act, lane 1 = beta pre-act, lanes 2:2+HV = value-hidden

    lane = jax.lax.broadcasted_iota(jnp.int32, (1, LANES), 1)
    act = jnp.where(lane < 2, _softplus(zh), jnp.maximum(zh, 0.0))         # [8,128]

    # value head second layer: wv2 broadcast across lanes -> V in every lane
    Vb = jnp.dot(act, wf, preferred_element_type=jnp.float32) + bf         # [8,128]

    # ---- alpha_beta_to_q ----
    alpha = act[:, 0:1]                                                    # [8,1]
    beta = act[:, 1:2]                                                     # [8,1]
    s = alpha + beta + 1e-8
    inv_s = pl.reciprocal(s, approx=True)        # EUP seed ...
    inv_s = inv_s * (2.0 - s * inv_s)            # ... + one Newton step (~f32 exact)
    A1 = alpha * inv_s - 0.5                                               # [8,1]
    sign = jnp.where(lane == 0, -1.0, 1.0)                                 # [-1,+1,+1,...]
    q_ref[...] = Vb + A1 * sign                  # single unmasked [8,128] store


# ------------------------------ JAX wrapper --------------------------------

def make_params(key):
    ks = jax.random.split(key, 22)
    s = 0.1
    return dict(
        nuc_emb=jax.random.normal(ks[0], (NUC_VOCAB, D), jnp.float32) * s,
        cig_emb=jax.random.normal(ks[1], (CIG_VOCAB, D), jnp.float32) * s,
        bq_vec=jax.random.normal(ks[2], (D,), jnp.float32) * s,
        m2r_vec=jax.random.normal(ks[3], (D,), jnp.float32) * s,
        isf_vec=jax.random.normal(ks[4], (D,), jnp.float32) * s,
        w1=jax.random.normal(ks[5], (D, H), jnp.float32) * s,
        b1=jax.random.normal(ks[14], (1, H), jnp.float32) * s,
        w2=jax.random.normal(ks[6], (H, D), jnp.float32) * s,
        b2=jax.random.normal(ks[15], (1, D), jnp.float32) * s,
        ref_emb=jax.random.normal(ks[7], (NUC_VOCAB, D), jnp.float32) * s,
        wah=jax.random.normal(ks[8], (D, 1), jnp.float32) * s,
        war=jax.random.normal(ks[9], (D, 1), jnp.float32) * s,
        ba=jax.random.normal(ks[16], (1, 1), jnp.float32) * s,
        wbh=jax.random.normal(ks[10], (D, 1), jnp.float32) * s,
        wbr=jax.random.normal(ks[11], (D, 1), jnp.float32) * s,
        bb=jax.random.normal(ks[17], (1, 1), jnp.float32) * s,
        wv1=jax.random.normal(ks[12], (D, HV), jnp.float32) * s,
        bv1=jax.random.normal(ks[18], (1, HV), jnp.float32) * s,
        wv2=jax.random.normal(ks[13], (HV, 1), jnp.float32) * s,
        bv2=jax.random.normal(ks[19], (1, 1), jnp.float32) * s,
    )


def _pack_params(params):
    """Pack every constant operand into ONE zero-padded lane-major [648,128] slab."""
    W = jnp.zeros((SLAB_ROWS, LANES), jnp.float32)
    # backbone
    W = W.at[W1_OFF:W1_OFF + D, 0:H].set(params['w1'])
    W = W.at[W2_OFF:W2_OFF + H, 0:D].set(params['w2'])
    # fused head: rows 0:128 of the block contract with h_sel, rows 128:256 with ref_e
    W = W.at[WH_OFF:WH_OFF + D, 0:1].set(params['wah'])
    W = W.at[WH_OFF:WH_OFF + D, 1:2].set(params['wbh'])
    W = W.at[WH_OFF:WH_OFF + D, 2:2 + HV].set(params['wv1'])
    W = W.at[WH_OFF + 128:WH_OFF + 128 + D, 0:1].set(params['war'])
    W = W.at[WH_OFF + 128:WH_OFF + 128 + D, 1:2].set(params['wbr'])
    # value-head second layer, broadcast across all 128 output lanes
    W = W.at[WF_OFF + 2:WF_OFF + 2 + HV, :].set(jnp.broadcast_to(params['wv2'], (HV, LANES)))
    # biases
    W = W.at[BIAS_OFF + 0, 0:H].set(params['b1'][0])
    W = W.at[BIAS_OFF + 1, 0:D].set(params['b2'][0])
    W = W.at[BIAS_OFF + 2, 0:1].set(params['ba'][0])
    W = W.at[BIAS_OFF + 2, 1:2].set(params['bb'][0])
    W = W.at[BIAS_OFF + 2, 2:2 + HV].set(params['bv1'][0])
    W = W.at[BIAS_OFF + 3, :].set(jnp.broadcast_to(params['bv2'][0], (LANES,)))
    return W


def _embed(params, td):
    """InputEmbeddingLayer stand-in (table gathers kept in plain JAX glue)."""
    x = (params['nuc_emb'][td['nucleotide_sequences']]
         + params['cig_emb'][td['cigar_encoding']]
         + td['base_qualities'][..., None] * params['bq_vec']
         + td['mapped_to_reverse'][..., None] * params['m2r_vec']
         + td['is_first'][..., None] * params['isf_vec'])
    return x.astype(jnp.float32)                                          # [B, S, D]


def _pos_encoding(pos):
    """Sinusoidal positional features [B, S, D] from integer positions."""
    half = D // 2
    inv_freq = 1.0 / (10000.0 ** (jnp.arange(half, dtype=jnp.float32) / half))
    ang = pos.astype(jnp.float32)[..., None] * inv_freq                   # [B, S, D/2]
    return jnp.concatenate([jnp.sin(ang), jnp.cos(ang)], axis=-1)         # [B, S, D]


def qnet_forward(params, td):
    # glue: embeddings + positional encoding, then select the mut-pos row per batch
    # BEFORE the (position-wise) backbone.  Assumes exactly one match per row,
    # matching the torch.nonzero selection semantics.
    x = _embed(params, td) + _pos_encoding(td['positions'])               # [B, S, D]
    mask = (td['positions'] == td['mut_pos'][:, None]).astype(jnp.float32)
    z_sel = jnp.einsum('bs,bsd->bd', mask, x)                             # [B, D]
    ref_e = params['ref_emb'][td['reference']]                            # [B, D]

    # single dynamic input slab (sublane-block 0 = z_sel, block 1 = ref_e)
    din = jnp.zeros((DIN_ROWS, LANES), jnp.float32)
    din = din.at[0:B, 0:D].set(z_sel)
    din = din.at[8:8 + B, 0:D].set(ref_e)

    wslab = _pack_params(params)   # TODO(synk): hoist/prefetch across calls if weights are static

    q_full = pl.pallas_call(
        qnet_kernel,
        out_shape=jax.ShapeDtypeStruct((8, LANES), jnp.float32),
        in_specs=[_vmem(), _vmem()],
        out_specs=_vmem(),
    )(din, wslab)
    return q_full[:B, 0:2]


# ------------------------- pure-JAX reference check -------------------------

def qnet_reference(params, td):
    """Faithful order: backbone over the full sequence, THEN select (as in PyTorch)."""
    x = _embed(params, td) + _pos_encoding(td['positions'])
    h1 = jnp.maximum(x @ params['w1'] + params['b1'][0], 0.0)
    h = x + (h1 @ params['w2'] + params['b2'][0])
    mask = (td['positions'] == td['mut_pos'][:, None]).astype(jnp.float32)
    h_sel = jnp.einsum('bs,bsd->bd', mask, h)
    ref_e = params['ref_emb'][td['reference']]
    alpha = jax.nn.softplus(h_sel @ params['wah'] + ref_e @ params['war'] + params['ba'][0])
    beta = jax.nn.softplus(h_sel @ params['wbh'] + ref_e @ params['wbr'] + params['bb'][0])
    V = jnp.maximum(h_sel @ params['wv1'] + params['bv1'][0], 0.0) @ params['wv2'] + params['bv2'][0]
    p = alpha / (alpha + beta + 1e-8)
    A1 = p - 0.5
    return jnp.concatenate([V - A1, V + A1], axis=-1)


if __name__ == "__main__":
    key = jax.random.PRNGKey(0)
    kp, k1, k2, k3, k4, k5, k6 = jax.random.split(key, 7)
    params = make_params(kp)

    positions = 100 + jnp.broadcast_to(jnp.arange(S, dtype=jnp.int32), (B, S))
    td = {
        'nucleotide_sequences': jax.random.randint(k1, (B, S), 0, NUC_VOCAB, jnp.int32),
        'base_qualities': jax.random.uniform(k2, (B, S), jnp.float32),
        'cigar_encoding': jax.random.randint(k3, (B, S), 0, CIG_VOCAB, jnp.int32),
        'is_first': jax.random.bernoulli(k4, 0.5, (B, S)).astype(jnp.float32),
        'mapped_to_reverse': jax.random.bernoulli(k5, 0.5, (B, S)).astype(jnp.float32),
        'positions': positions,
        'reference': jax.random.randint(k6, (B,), 0, NUC_VOCAB, jnp.int32),
        # exactly one position per batch row equals mut_pos (matches torch.nonzero select)
        'mut_pos': jnp.array([100 + 3, 100 + 5], dtype=jnp.int32),
    }

    q = jax.block_until_ready(qnet_forward(params, td))
    q_ref = qnet_reference(params, td)
    assert q.shape == (B, 2)
    assert jnp.allclose(q, q_ref, atol=1e-4, rtol=1e-4), (q, q_ref)
    print("KERNEL_OK")
</pallas_src>

<mosaic_0001>
module attributes {stable_mosaic.version = 11 : i64} {
  func.func @qnet_kernel(%arg0: memref<16x128xf32, #tpu.memory_space<vmem>>, %arg1: memref<648x128xf32, #tpu.memory_space<vmem>>, %arg2: memref<8x128xf32, #tpu.memory_space<vmem>>) attributes {dimension_semantics = [], scalar_prefetch = 0 : i64, scratch_operands = 0 : i64, tpu.core_type = #tpu.core_type<tc>} {
    %c0 = arith.constant 0 : index
    %c0_0 = arith.constant 0 : index
    %0 = vector.load %arg0[%c0, %c0_0] : memref<16x128xf32, #tpu.memory_space<vmem>>, vector<8x128xf32>
    %c8 = arith.constant 8 : index
    %c0_1 = arith.constant 0 : index
    %1 = vector.load %arg0[%c8, %c0_1] : memref<16x128xf32, #tpu.memory_space<vmem>>, vector<8x128xf32>
    %c0_2 = arith.constant 0 : index
    %c0_3 = arith.constant 0 : index
    %2 = vector.load %arg1[%c0_2, %c0_3] : memref<648x128xf32, #tpu.memory_space<vmem>>, vector<128x128xf32>
    %c128 = arith.constant 128 : index
    %c0_4 = arith.constant 0 : index
    %3 = vector.load %arg1[%c128, %c0_4] : memref<648x128xf32, #tpu.memory_space<vmem>>, vector<128x128xf32>
    %c256 = arith.constant 256 : index
    %c0_5 = arith.constant 0 : index
    %4 = vector.load %arg1[%c256, %c0_5] : memref<648x128xf32, #tpu.memory_space<vmem>>, vector<256x128xf32>
    %c512 = arith.constant 512 : index
    %c0_6 = arith.constant 0 : index
    %5 = vector.load %arg1[%c512, %c0_6] : memref<648x128xf32, #tpu.memory_space<vmem>>, vector<128x128xf32>
    %c640 = arith.constant 640 : index
    %c0_7 = arith.constant 0 : index
    %6 = vector.load %arg1[%c640, %c0_7] : memref<648x128xf32, #tpu.memory_space<vmem>>, vector<1x128xf32>
    %c641 = arith.constant 641 : index
    %c0_8 = arith.constant 0 : index
    %7 = vector.load %arg1[%c641, %c0_8] : memref<648x128xf32, #tpu.memory_space<vmem>>, vector<1x128xf32>
    %c642 = arith.constant 642 : index
    %c0_9 = arith.constant 0 : index
    %8 = vector.load %arg1[%c642, %c0_9] : memref<648x128xf32, #tpu.memory_space<vmem>>, vector<1x128xf32>
    %c643 = arith.constant 643 : index
    %c0_10 = arith.constant 0 : index
    %9 = vector.load %arg1[%c643, %c0_10] : memref<648x128xf32, #tpu.memory_space<vmem>>, vector<1x128xf32>
    %cst = arith.constant dense<0.000000e+00> : vector<8x128xf32>
    %10 = tpu.matmul %0, %2, %cst {dimension_numbers = #tpu.dot_dimension_numbers<[1], [0], [0], [1], [0, 0, 1, 1], [], []>} : vector<8x128xf32>, vector<128x128xf32>, vector<8x128xf32> -> vector<8x128xf32>
    %11 = vector.broadcast %6 : vector<1x128xf32> to vector<8x128xf32>
    %12 = arith.addf %10, %11 : vector<8x128xf32>
    %cst_11 = arith.constant 0.000000e+00 : f32
    %13 = vector.broadcast %cst_11 : f32 to vector<8x128xf32>
    %14 = arith.maximumf %12, %13 : vector<8x128xf32>
    %cst_12 = arith.constant dense<0.000000e+00> : vector<8x128xf32>
    %15 = tpu.matmul %14, %3, %cst_12 {dimension_numbers = #tpu.dot_dimension_numbers<[1], [0], [0], [1], [0, 0, 1, 1], [], []>} : vector<8x128xf32>, vector<128x128xf32>, vector<8x128xf32> -> vector<8x128xf32>
    %16 = arith.addf %0, %15 : vector<8x128xf32>
    %17 = vector.broadcast %7 : vector<1x128xf32> to vector<8x128xf32>
    %18 = arith.addf %16, %17 : vector<8x128xf32>
    %19 = tpu.concatenate %18, %1 in 1 : vector<8x128xf32>, vector<8x128xf32> -> vector<8x256xf32>
    %cst_13 = arith.constant dense<0.000000e+00> : vector<8x128xf32>
    %20 = tpu.matmul %19, %4, %cst_13 {dimension_numbers = #tpu.dot_dimension_numbers<[1], [0], [0], [1], [0, 0, 1, 1], [], []>} : vector<8x256xf32>, vector<256x128xf32>, vector<8x128xf32> -> vector<8x128xf32>
    %21 = vector.broadcast %8 : vector<1x128xf32> to vector<8x128xf32>
    %22 = arith.addf %20, %21 : vector<8x128xf32>
    %23 = tpu.iota {dimensions = array<i32: 1>} : vector<1x128xi32>
    %c2_i32 = arith.constant 2 : i32
    %24 = vector.broadcast %c2_i32 : i32 to vector<1x128xi32>
    %25 = arith.cmpi slt, %23, %24 : vector<1x128xi32>
    %cst_14 = arith.constant 0.000000e+00 : f32
    %26 = vector.broadcast %cst_14 : f32 to vector<8x128xf32>
    %27 = arith.maximumf %22, %26 : vector<8x128xf32>
    %28 = math.absf %22 : vector<8x128xf32>
    %cst_15 = arith.constant 0.000000e+00 : f32
    %29 = vector.broadcast %cst_15 : f32 to vector<8x128xf32>
    %30 = arith.subf %29, %28 : vector<8x128xf32>
    %31 = math.exp %30 : vector<8x128xf32>
    %cst_16 = arith.constant 1.000000e+00 : f32
    %32 = vector.broadcast %cst_16 : f32 to vector<8x128xf32>
    %33 = arith.addf %32, %31 : vector<8x128xf32>
    %34 = math.log %33 : vector<8x128xf32>
    %35 = arith.addf %27, %34 : vector<8x128xf32>
    %cst_17 = arith.constant 0.000000e+00 : f32
    %36 = vector.broadcast %cst_17 : f32 to vector<8x128xf32>
    %37 = arith.maximumf %22, %36 : vector<8x128xf32>
    %38 = vector.shape_cast %25 : vector<1x128xi1> to vector<1x128xi1>
    %39 = vector.broadcast %38 : vector<1x128xi1> to vector<8x128xi1>
    %40 = arith.select %39, %35, %37 : vector<8x128xi1>, vector<8x128xf32>
    %cst_18 = arith.constant dense<0.000000e+00> : vector<8x128xf32>
    %41 = tpu.matmul %40, %5, %cst_18 {dimension_numbers = #tpu.dot_dimension_numbers<[1], [0], [0], [1], [0, 0, 1, 1], [], []>} : vector<8x128xf32>, vector<128x128xf32>, vector<8x128xf32> -> vector<8x128xf32>
    %42 = vector.broadcast %9 : vector<1x128xf32> to vector<8x128xf32>
    %43 = arith.addf %41, %42 : vector<8x128xf32>
    %44 = vector.extract_strided_slice %40 {offsets = [0, 0], sizes = [8, 1], strides = [1, 1]} : vector<8x128xf32> to vector<8x1xf32>
    %45 = vector.extract_strided_slice %40 {offsets = [0, 1], sizes = [8, 1], strides = [1, 1]} : vector<8x128xf32> to vector<8x1xf32>
    %46 = arith.addf %44, %45 : vector<8x1xf32>
    %cst_19 = arith.constant 9.99999993E-9 : f32
    %47 = vector.broadcast %cst_19 : f32 to vector<8x1xf32>
    %48 = arith.addf %46, %47 : vector<8x1xf32>
    %49 = tpu.reciprocal %48 {approx = true} : vector<8x1xf32> -> vector<8x1xf32>
    %50 = arith.mulf %48, %49 : vector<8x1xf32>
    %cst_20 = arith.constant 2.000000e+00 : f32
    %51 = vector.broadcast %cst_20 : f32 to vector<8x1xf32>
    %52 = arith.subf %51, %50 : vector<8x1xf32>
    %53 = arith.mulf %49, %52 : vector<8x1xf32>
    %54 = arith.mulf %44, %53 : vector<8x1xf32>
    %cst_21 = arith.constant 5.000000e-01 : f32
    %55 = vector.broadcast %cst_21 : f32 to vector<8x1xf32>
    %56 = arith.subf %54, %55 : vector<8x1xf32>
    %c0_i32 = arith.constant 0 : i32
    %57 = vector.broadcast %c0_i32 : i32 to vector<1x128xi32>
    %58 = arith.cmpi eq, %23, %57 : vector<1x128xi32>
    %cst_22 = arith.constant -1.000000e+00 : f32
    %cst_23 = arith.constant 1.000000e+00 : f32
    %59 = vector.broadcast %cst_22 : f32 to vector<1x128xf32>
    %60 = vector.broadcast %cst_23 : f32 to vector<1x128xf32>
    %61 = arith.select %58, %59, %60 : vector<1x128xi1>, vector<1x128xf32>
    %62 = vector.broadcast %56 : vector<8x1xf32> to vector<8x128xf32>
    %63 = vector.broadcast %61 : vector<1x128xf32> to vector<8x128xf32>
    %64 = arith.mulf %62, %63 : vector<8x128xf32>
    %65 = arith.addf %43, %64 : vector<8x128xf32>
    %c0_24 = arith.constant 0 : index
    %c0_25 = arith.constant 0 : index
    %66 = vector.load %arg2[%c0_24, %c0_25] : memref<8x128xf32, #tpu.memory_space<vmem>>, vector<8x128xf32>
    tpu.vector_store %arg2[%c0_24, %c0_25], %65 {strides = array<i32>} : memref<8x128xf32, #tpu.memory_space<vmem>>, vector<8x128xf32>,
    return
  }
}

</mosaic_0001>

<bundles_post_ra>
// kernel: tpu_custom_call.1
= control target key start
LH: loop header
LB: loop body
LE: loop exit
PB: predicated region body
PF: predicated region fallthrough
CT: control target
= control target key end

     0   :  { %7 = vsyncpa [#allocation3], 0  ;;  %s849_s0 = inlined_call_operand.hbm [shape: f32[16,128], index: 0, kind: input, shape index: {}]   ;;  %s850_s1 = inlined_call_operand.hbm [shape: f32[648,128], index: 1, kind: input, shape index: {}]   ;;  %s851_s2 = inlined_call_operand.hbm [shape: f32[8,128], index: 2, kind: output, shape index: {}]  }
   0x1   :  { %8 = vsyncpa [#allocation6], 0 }
   0x2   :  { %9 = vsyncpa [#allocation4], 0  ;;  %s757_s9 = smov [#allocation2]  }
   0x3   :  { %s15_s10 = sshll.u32 %s757_s9, 4  ;;  %s16_s10 = int_to_ptr.vmem [resolvable:$true] %s15_s10 }
   0x4   :  { %s699_s11 = scalar_lea.vmem %s16_s10, 256  ;;  %p704_p1 = scmp.lt.s32.totalorder %s16_s10, %s16_s10 }
   0x5   :  { %p700_p0 = scmp.ne.s32.totalorder %s16_s10, %s699_s11  ;;  %p705_p2 = scmp.lt.s32.totalorder %s699_s11, %s699_s11 }
   0x7   :  { %p706_p3 = por %p705_p2, %p704_p1 }
   0x9   :  { %p707_p4 = pnand %p706_p3, %p700_p0 }
   0xb   :  { %710 = shalt.err (!%p707_p4)
}
   0xc   :  { %s758_s12 = smov 128   ;;  %s759_s13 = smov 8  }
   0xd   :  { %21 = dma.hbm_to_vmem [thread:$0]  %s849_s0, 256, %s16_s10, [#allocation3], %s758_s12, %s758_s12, %s759_s13  }
   0xe   :  { %s760_s16 = smov [#allocation5]  }
   0xf   :  { %s27_s17 = sshll.u32 %s760_s16, 4  ;;  %s28_s17 = int_to_ptr.vmem [resolvable:$true] %s27_s17 }
  0x10   :  { %s719_s18 = scalar_lea.vmem %s28_s17, 10368  ;;  %p724_p6 = scmp.lt.s32.totalorder %s28_s17, %s28_s17 }
  0x11   :  { %p720_p5 = scmp.ne.s32.totalorder %s28_s17, %s719_s18  ;;  %p725_p7 = scmp.lt.s32.totalorder %s719_s18, %s719_s18 }
  0x13   :  { %p726_p8 = por %p725_p7, %p724_p6 }
  0x15   :  { %p727_p9 = pnand %p726_p8, %p720_p5 }
  0x17   :  { %730 = shalt.err (!%p727_p9)
}
  0x18   :  { %33 = dma.hbm_to_vmem [thread:$0]  %s850_s1, 10368, %s28_s17, [#allocation6], %s758_s12, %s758_s12, %s759_s13  }
  0x19   :  { %751 = dma.done.wait [#allocation3], 256  }
  0x1a   :  { %752 = vsyncadd [#allocation3], 4294967040 }
  0x1b   :  { %753 = dma.done.wait [#allocation6], 10368  }
  0x1c   :  { %754 = vsyncadd [#allocation6], 4294956928  ;;  %v761_v0 = vmov 0.0   ;;  %vm762_vm0 = vmmov 0   ;;  %v57_v1 = vld [vmem:[#allocation5 + $0x78] sm:$0xff]  ;;  %v56_v2 = vld [vmem:[#allocation5 + $0x70] sm:$0xff] }
  0x1d   :  { %569 = vmatprep.subr.mxu0 %v761_v0  ;;  %601 = vmatprep.mubr.msk.f32.mxu0 %vm762_vm0, %v761_v0  ;;  %v55_v3 = vld [vmem:[#allocation5 + $0x68] sm:$0xff]  ;;  %v54_v4 = vld [vmem:[#allocation5 + $0x60] sm:$0xff]  ;;  %v73_v5 = vld [vmem:[#allocation5 + $0xf8] sm:$0xff]  ;;  %s763_s0 = smov 127   ;;  %s766_s1 = smov [#allocation7]  }
  0x1e   :  { %604 = vmatprep.subr.mxu1 %v761_v0  ;;  %636 = vmatprep.mubr.msk.f32.mxu1 %vm762_vm0, %v761_v0  ;;  %v53_v6 = vld [vmem:[#allocation5 + $0x58] sm:$0xff]  ;;  %v72_v7 = vld [vmem:[#allocation5 + $0xf0] sm:$0xff]  ;;  %v71_v8 = vld [vmem:[#allocation5 + $0xe8] sm:$0xff]  ;;  %s468_s21 = sshll.u32 %s766_s1, 4  ;;  %s469_s21 = int_to_ptr.vmem [resolvable:$true] %s468_s21 }
  0x1f   :  { %570 = vmatpush3.msra.mxu0 %v57_v1  ;;  %605 = vmatpush3.msra.mxu1 %v73_v5  ;;  %v52_v9 = vld [vmem:[#allocation5 + $0x50] sm:$0xff]  ;;  %v70_v10 = vld [vmem:[#allocation5 + $0xe0] sm:$0xff]  ;;  %v51_v11 = vld [vmem:[#allocation5 + $0x48] sm:$0xff]  ;;  %s731_s22 = scalar_lea.vmem %s469_s21, 128  ;;  %p736_p11 = scmp.lt.s32.totalorder %s469_s21, %s469_s21 }
  0x20   :  { %571 = vmatprep.subr.mxu0 %v761_v0  ;;  %606 = vmatprep.subr.mxu1 %v761_v0  ;;  %v69_v12 = vld [vmem:[#allocation5 + $0xd8] sm:$0xff]  ;;  %v50_v13 = vld [vmem:[#allocation5 + $0x40] sm:$0xff]  ;;  %v68_v14 = vld [vmem:[#allocation5 + $0xd0] sm:$0xff]  ;;  %p732_p10 = scmp.ne.s32.totalorder %s469_s21, %s731_s22  ;;  %p737_p12 = scmp.lt.s32.totalorder %s731_s22, %s731_s22 }
  0x21   :  { %572 = vmatpush3.msra.mxu0 %v56_v2  ;;  %607 = vmatpush3.msra.mxu1 %v72_v7  ;;  %v49_v15 = vld [vmem:[#allocation5 + $0x38] sm:$0xff]  ;;  %v67_v16 = vld [vmem:[#allocation5 + $0xc8] sm:$0xff]  ;;  %v48_v17 = vld [vmem:[#allocation5 + $0x30] sm:$0xff] }
  0x22   :  { %573 = vmatprep.subr.mxu0 %v761_v0  ;;  %608 = vmatprep.subr.mxu1 %v761_v0  ;;  %v66_v18 = vld [vmem:[#allocation5 + $0xc0] sm:$0xff]  ;;  %v47_v19 = vld [vmem:[#allocation5 + $0x28] sm:$0xff]  ;;  %v65_v20 = vld [vmem:[#allocation5 + $0xb8] sm:$0xff]  ;;  %p738_p13 = por %p737_p12, %p736_p11 }
  0x23   :  { %574 = vmatpush3.msra.mxu0 %v55_v3  ;;  %609 = vmatpush3.msra.mxu1 %v71_v8  ;;  %v46_v21 = vld [vmem:[#allocation5 + $0x20] sm:$0xff]  ;;  %v64_v22 = vld [vmem:[#allocation5 + $0xb0] sm:$0xff]  ;;  %v45_v23 = vld [vmem:[#allocation5 + $0x18] sm:$0xff] }
  0x24   :  { %575 = vmatprep.subr.mxu0 %v761_v0  ;;  %610 = vmatprep.subr.mxu1 %v761_v0  ;;  %v63_v24 = vld [vmem:[#allocation5 + $0xa8] sm:$0xff]  ;;  %v44_v25 = vld [vmem:[#allocation5 + $0x10] sm:$0xff]  ;;  %v62_v26 = vld [vmem:[#allocation5 + $0xa0] sm:$0xff]  ;;  %p739_p0 = pnand %p738_p13, %p732_p10 }
  0x25   :  { %576 = vmatpush3.msra.mxu0 %v54_v4  ;;  %611 = vmatpush3.msra.mxu1 %v70_v10  ;;  %v43_v27 = vld [vmem:[#allocation5 + $0x8] sm:$0xff]  ;;  %v61_v28 = vld [vmem:[#allocation5 + $0x98] sm:$0xff]  ;;  %v42_v29 = vld [vmem:[#allocation5] sm:$0xff] }
  0x26   :  { %577 = vmatprep.subr.mxu0 %v761_v0  ;;  %612 = vmatprep.subr.mxu1 %v761_v0  ;;  %v819_v30 = vld [vmem:[#allocation2] sm:$0xff]  ;;  %v59_v32 = vld [vmem:[#allocation5 + $0x88] sm:$0xff]  ;;  %v58_v33 = vld [vmem:[#allocation5 + $0x80] sm:$0xff] }
  0x27   :  { %578 = vmatpush3.msra.mxu0 %v53_v6  ;;  %613 = vmatpush3.msra.mxu1 %v69_v12  ;;  %v60_v31 = vld [vmem:[#allocation5 + $0x90] sm:$0xff]  ;;  %v105_v34 = vld [vmem:[#allocation5 + $0x1f8] sm:$0xff]  ;;  %v103_v38 = vld [vmem:[#allocation5 + $0x1e8] sm:$0xff] }
  0x28   :  { %579 = vmatprep.subr.mxu0 %v761_v0  ;;  %614 = vmatprep.subr.mxu1 %v761_v0  ;;  %v89_v35 = vld [vmem:[#allocation5 + $0x178] sm:$0xff]  ;;  %v104_v36 = vld [vmem:[#allocation5 + $0x1f0] sm:$0xff]  ;;  %v87_v39 = vld [vmem:[#allocation5 + $0x168] sm:$0xff] }
  0x29   :  { %580 = vmatpush3.msra.mxu0 %v52_v9  ;;  %615 = vmatpush3.msra.mxu1 %v68_v14  ;;  %v88_v37 = vld [vmem:[#allocation5 + $0x170] sm:$0xff]  ;;  %v102_v40 = vld [vmem:[#allocation5 + $0x1e0] sm:$0xff]  ;;  %v101_v42 = vld [vmem:[#allocation5 + $0x1d8] sm:$0xff] }
  0x2a   :  { %581 = vmatprep.subr.mxu0 %v761_v0  ;;  %616 = vmatprep.subr.mxu1 %v761_v0  ;;  %v86_v41 = vld [vmem:[#allocation5 + $0x160] sm:$0xff]  ;;  %v85_v43 = vld [vmem:[#allocation5 + $0x158] sm:$0xff]  ;;  %v100_v44 = vld [vmem:[#allocation5 + $0x1d0] sm:$0xff] }
  0x2b   :  { %582 = vmatpush3.msra.mxu0 %v51_v11  ;;  %617 = vmatpush3.msra.mxu1 %v67_v16  ;;  %v84_v45 = vld [vmem:[#allocation5 + $0x150] sm:$0xff]  ;;  %v99_v46 = vld [vmem:[#allocation5 + $0x1c8] sm:$0xff]  ;;  %v98_v48 = vld [vmem:[#allocation5 + $0x1c0] sm:$0xff] }
  0x2c   :  { %583 = vmatprep.subr.mxu0 %v761_v0  ;;  %618 = vmatprep.subr.mxu1 %v761_v0  ;;  %v83_v47 = vld [vmem:[#allocation5 + $0x148] sm:$0xff]  ;;  %v82_v49 = vld [vmem:[#allocation5 + $0x140] sm:$0xff]  ;;  %v97_v50 = vld [vmem:[#allocation5 + $0x1b8] sm:$0xff] }
  0x2d   :  { %584 = vmatpush3.msra.mxu0 %v50_v13  ;;  %619 = vmatpush3.msra.mxu1 %v66_v18  ;;  %v81_v51 = vld [vmem:[#allocation5 + $0x138] sm:$0xff]  ;;  %v96_v52 = vld [vmem:[#allocation5 + $0x1b0] sm:$0xff]  ;;  %v95_v54 = vld [vmem:[#allocation5 + $0x1a8] sm:$0xff] }
  0x2e   :  { %585 = vmatprep.subr.mxu0 %v761_v0  ;;  %620 = vmatprep.subr.mxu1 %v761_v0  ;;  %v80_v53 = vld [vmem:[#allocation5 + $0x130] sm:$0xff]  ;;  %v79_v55 = vld [vmem:[#allocation5 + $0x128] sm:$0xff]  ;;  %v94_v56 = vld [vmem:[#allocation5 + $0x1a0] sm:$0xff] }
  0x2f   :  { %586 = vmatpush3.msra.mxu0 %v49_v15  ;;  %621 = vmatpush3.msra.mxu1 %v65_v20  ;;  %v78_v57 = vld [vmem:[#allocation5 + $0x120] sm:$0xff]  ;;  %v93_v58 = vld [vmem:[#allocation5 + $0x198] sm:$0xff]  ;;  %v92_v60 = vld [vmem:[#allocation5 + $0x190] sm:$0xff] }
  0x30   :  { %587 = vmatprep.subr.mxu0 %v761_v0  ;;  %622 = vmatprep.subr.mxu1 %v761_v0  ;;  %v77_v59 = vld [vmem:[#allocation5 + $0x118] sm:$0xff]  ;;  %v478_v61 = vld [vmem:[#allocation5 + $0x280] ss:$0 sm:$0xff]  ;;  %v76_v3 = vld [vmem:[#allocation5 + $0x110] sm:$0xff] }
  0x31   :  { %588 = vmatpush3.msra.mxu0 %v48_v17  ;;  %623 = vmatpush3.msra.mxu1 %v64_v22  ;;  %v91_v4 = vld [vmem:[#allocation5 + $0x188] sm:$0xff]  ;;  %v90_v6 = vld [vmem:[#allocation5 + $0x180] sm:$0xff]  ;;  %v41_v8 = vld [vmem:[#allocation2 + $0x8] sm:$0xff] }
  0x32   :  { %589 = vmatprep.subr.mxu0 %v761_v0  ;;  %624 = vmatprep.subr.mxu1 %v761_v0  ;;  %v75_v5 = vld [vmem:[#allocation5 + $0x108] sm:$0xff]  ;;  %v74_v7 = vld [vmem:[#allocation5 + $0x100] sm:$0xff]  ;;  %v121_v14 = vld [vmem:[#allocation5 + $0x278] sm:$0xff] }
  0x33   :  { %590 = vmatpush3.msra.mxu0 %v47_v19  ;;  %625 = vmatpush3.msra.mxu1 %v63_v24  ;;  %v479_v9 = vld [vmem:[#allocation5 + $0x281] ss:$0 sm:$0xff]  ;;  %v120_v15 = vld [vmem:[#allocation5 + $0x270] sm:$0xff]  ;;  %v119_v16 = vld [vmem:[#allocation5 + $0x268] sm:$0xff] }
  0x34   :  { %591 = vmatprep.subr.mxu0 %v761_v0  ;;  %626 = vmatprep.subr.mxu1 %v761_v0  ;;  %v118_v17 = vld [vmem:[#allocation5 + $0x260] sm:$0xff]  ;;  %v117_v18 = vld [vmem:[#allocation5 + $0x258] sm:$0xff]  ;;  %v116_v19 = vld [vmem:[#allocation5 + $0x250] sm:$0xff] }
  0x35   :  { %592 = vmatpush3.msra.mxu0 %v46_v21  ;;  %627 = vmatpush3.msra.mxu1 %v62_v26  ;;  %v115_v20 = vld [vmem:[#allocation5 + $0x248] sm:$0xff]  ;;  %v114_v21 = vld [vmem:[#allocation5 + $0x240] sm:$0xff]  ;;  %v113_v22 = vld [vmem:[#allocation5 + $0x238] sm:$0xff] }
  0x36   :  { %593 = vmatprep.subr.mxu0 %v761_v0  ;;  %628 = vmatprep.subr.mxu1 %v761_v0  ;;  %v111_v24 = vld [vmem:[#allocation5 + $0x228] sm:$0xff]  ;;  %v109_v26 = vld [vmem:[#allocation5 + $0x218] sm:$0xff] }
  0x37   :  { %594 = vmatpush3.msra.mxu0 %v45_v23  ;;  %629 = vmatpush3.msra.mxu1 %v61_v28  ;;  %v112_v23 = vld [vmem:[#allocation5 + $0x230] sm:$0xff]  ;;  %v107_v28 = vld [vmem:[#allocation5 + $0x208] sm:$0xff] }
  0x38   :  { %595 = vmatprep.subr.mxu0 %v761_v0  ;;  %630 = vmatprep.subr.mxu1 %v761_v0 }
  0x39   :  { %596 = vmatpush3.msra.mxu0 %v44_v25  ;;  %631 = vmatpush3.msra.mxu1 %v60_v31  ;;  %v110_v25 = vld [vmem:[#allocation5 + $0x220] sm:$0xff] }
  0x3a   :  { %597 = vmatprep.subr.mxu0 %v761_v0  ;;  %632 = vmatprep.subr.mxu1 %v761_v0  ;;  %v480_v31 = vld [vmem:[#allocation5 + $0x282] ss:$0 sm:$0xff] }
  0x3b   :  { %598 = vmatpush3.msra.mxu0 %v43_v27  ;;  %633 = vmatpush3.msra.mxu1 %v59_v32  ;;  %v108_v27 = vld [vmem:[#allocation5 + $0x210] sm:$0xff] }
  0x3c   :  { %599 = vmatprep.subr.mxu0 %v761_v0  ;;  %634 = vmatprep.subr.mxu1 %v761_v0 }
  0x3d   :  { %600 = vmatpush3.msra.mxu0 %v42_v29  ;;  %635 = vmatpush3.msra.mxu1 %v58_v33  ;;  %v106_v29 = vld [vmem:[#allocation5 + $0x200] sm:$0xff] }
  0x3e   :  { %602 = vmatmul.mubr.f32.vlgmr.msra.gmra.mxu0 %v819_v30  ;;  %639 = vmatprep.subr.mxu1 %v761_v0 }
  0x3f   :  { %517 = vmatprep.subr.mxu0 %v105_v34  ;;  %345 = vmatprep.mubr.f32.mxu0 %v41_v8 }
  0x40   :  { %518 = vmatpush3.msra.mxu0 %v89_v35 }
  0x41   :  { %519 = vmatprep.subr.mxu0 %v104_v36 }
  0x42   :  { %520 = vmatpush3.msra.mxu0 %v88_v37 }
  0x43   :  { %521 = vmatprep.subr.mxu0 %v103_v38 }
  0x44   :  { %522 = vmatpush3.msra.mxu0 %v87_v39 }
  0x45   :  { %523 = vmatprep.subr.mxu0 %v102_v40  ;;  %v351_v40 = vlaneseq }
  0x46   :  { %524 = vmatpush3.msra.mxu0 %v86_v41 }
  0x47   :  { %525 = vmatprep.subr.mxu0 %v101_v42  ;;  %v352_v41 = vand.u32 127, %v351_v40 }
  0x48   :  { %526 = vmatpush3.msra.mxu0 %v85_v43 }
  0x49   :  { %527 = vmatprep.subr.mxu0 %v100_v44  ;;  %vm353_vm1 = vcmp.lt.s32.totalorder %v352_v41, 2  ;;  %vm452_vm2 = vcmp.eq.s32.totalorder %v352_v41, 0 }
  0x4a   :  { %528 = vmatpush3.msra.mxu0 %v84_v45 }
  0x4b   :  { %529 = vmatprep.subr.mxu0 %v99_v46  ;;  %v764_v46 = vmov 0  }
  0x4c   :  { %530 = vmatpush3.msra.mxu0 %v83_v47  ;;  %684 = vset.pattern.permute.xlu0 %v764_v46 }
  0x4d   :  { %531 = vmatprep.subr.mxu0 %v98_v48 }
  0x4e   :  { %532 = vmatpush3.msra.mxu0 %v82_v49 }
  0x4f   :  { %533 = vmatprep.subr.mxu0 %v97_v50 }
  0x50   :  { %534 = vmatpush3.msra.mxu0 %v81_v51 }
  0x51   :  { %535 = vmatprep.subr.mxu0 %v96_v52 }
  0x52   :  { %536 = vmatpush3.msra.mxu0 %v80_v53 }
  0x53   :  { %537 = vmatprep.subr.mxu0 %v95_v54 }
  0x54   :  { %538 = vmatpush3.msra.mxu0 %v79_v55 }
  0x55   :  { %539 = vmatprep.subr.mxu0 %v94_v56 }
  0x56   :  { %540 = vmatpush3.msra.mxu0 %v78_v57 }
  0x57   :  { %541 = vmatprep.subr.mxu0 %v93_v58  ;;  %v481_v58 = vld [vmem:[#allocation5 + $0x283] ss:$0 sm:$0xff] }
  0x58   :  { %542 = vmatpush3.msra.mxu0 %v77_v59  ;;  %v765_v59 = vmov 1.0  }
  0x59   :  { %543 = vmatprep.subr.mxu0 %v92_v60  ;;  %v453_v60 = vsel %vm452_vm2, -1.0, %v765_v59 }
  0x5a   :  { %544 = vmatpush3.msra.mxu0 %v76_v3 }
  0x5b   :  { %545 = vmatprep.subr.mxu0 %v91_v4 }
  0x5c   :  { %546 = vmatpush3.msra.mxu0 %v75_v5 }
  0x5d   :  { %547 = vmatprep.subr.mxu0 %v90_v6 }
  0x5e   :  { %548 = vmatpush3.msra.mxu0 %v74_v7 }
  0xfe   :  { %v196_v62 = vpop.f32.mrf.mxu0 }
  0xff   :  { %v197_v63 = vadd.f32 %v478_v61, %v196_v62 }
 0x100   :  { %v603_v1 = vpop.f32.mrf.mxu0 }
 0x101   :  { %v200_v2 = vmax.f32 %v197_v63, 0.0 }
 0x103   :  { %637 = vmatmul.mubr.f32.vlgmr.msra.gmra.mxu1 %v200_v2 }
 0x104   :  { %671 = vmatprep.mubr.msk.f32.mxu1 %vm762_vm0, %v761_v0  ;;  %640 = vmatpush3.msra.mxu1 %v121_v14 }
 0x105   :  { %641 = vmatprep.subr.mxu1 %v761_v0 }
 0x106   :  { %642 = vmatpush3.msra.mxu1 %v120_v15 }
 0x107   :  { %643 = vmatprep.subr.mxu1 %v761_v0 }
 0x108   :  { %644 = vmatpush3.msra.mxu1 %v119_v16 }
 0x109   :  { %645 = vmatprep.subr.mxu1 %v761_v0 }
 0x10a   :  { %646 = vmatpush3.msra.mxu1 %v118_v17 }
 0x10b   :  { %647 = vmatprep.subr.mxu1 %v761_v0 }
 0x10c   :  { %648 = vmatpush3.msra.mxu1 %v117_v18 }
 0x10d   :  { %649 = vmatprep.subr.mxu1 %v761_v0 }
 0x10e   :  { %650 = vmatpush3.msra.mxu1 %v116_v19 }
 0x10f   :  { %651 = vmatprep.subr.mxu1 %v761_v0 }
 0x110   :  { %652 = vmatpush3.msra.mxu1 %v115_v20 }
 0x111   :  { %653 = vmatprep.subr.mxu1 %v761_v0 }
 0x112   :  { %654 = vmatpush3.msra.mxu1 %v114_v21 }
 0x113   :  { %655 = vmatprep.subr.mxu1 %v761_v0 }
 0x114   :  { %656 = vmatpush3.msra.mxu1 %v113_v22 }
 0x115   :  { %657 = vmatprep.subr.mxu1 %v761_v0 }
 0x116   :  { %658 = vmatpush3.msra.mxu1 %v112_v23 }
 0x117   :  { %659 = vmatprep.subr.mxu1 %v761_v0 }
 0x118   :  { %660 = vmatpush3.msra.mxu1 %v111_v24 }
 0x119   :  { %661 = vmatprep.subr.mxu1 %v761_v0 }
 0x11a   :  { %662 = vmatpush3.msra.mxu1 %v110_v25 }
 0x11b   :  { %663 = vmatprep.subr.mxu1 %v761_v0 }
 0x11c   :  { %664 = vmatpush3.msra.mxu1 %v109_v26 }
 0x11d   :  { %665 = vmatprep.subr.mxu1 %v761_v0 }
 0x11e   :  { %666 = vmatpush3.msra.mxu1 %v108_v27 }
 0x11f   :  { %667 = vmatprep.subr.mxu1 %v761_v0 }
 0x120   :  { %668 = vmatpush3.msra.mxu1 %v107_v28 }
 0x121   :  { %669 = vmatprep.subr.mxu1 %v761_v0 }
 0x122   :  { %670 = vmatpush3.msra.mxu1 %v106_v29 }
 0x1c3   :  { %v267_v10 = vpop.f32.mrf.mxu1 }
 0x1c4   :  { %v271_v11 = vadd.f32 %v267_v10, %v819_v30 }
 0x1c5   :  { %v638_v12 = vpop.f32.mrf.mxu1 }
 0x1c6   :  { %v276_v13 = vadd.f32 %v479_v9, %v271_v11 }
 0x1c8   :  { %346 = vmatmul.mubr.f32.vlgmr.msra.gmra.mxu0 %v276_v13 }
 0x288   :  { %v549_v30 = vpop.f32.mrf.mxu0 }
 0x28a   :  { %v550_v32 = vpop.f32.mrf.mxu0 }
 0x28b   :  { %v551_v33 = vadd.f32 %v550_v32, %v549_v30 }
 0x28d   :  { %v348_v34 = vadd.f32 %v551_v33, %v480_v31 }
 0x28f   :  { %v355_v35 = vand.u32 2147483647, %v348_v34  ;;  %v354_v43 = vmax.f32 %v348_v34, 0.0 }
 0x291   :  { %v356_v36 = vsub.f32 0.0, %v355_v35 }
 0x293   :  { %v357_v37 = vmul.f32 1.442695, %v356_v36 }
 0x295   :  { %685 = vpow2.f32 %v357_v37 }
 0x2a2   :  { %v686_v38 = vpop.eup %685 }
 0x2a3   :  { %v359_v39 = vadd.f32 1.0, %v686_v38 }
 0x2a5   :  { %687 = vlog2.f32 %v359_v39 }
 0x2b2   :  { %v688_v42 = vpop.eup %687 }
 0x2b3   :  { %v361_v44 = vmul.f32 0.6931472, %v688_v42 }
 0x2b5   :  { %v362_v0 = vadd.f32 %v361_v44, %v354_v43 }
 0x2b7   :  { %v365_v45 = vsel %vm353_vm1, %v362_v0, %v354_v43 }
 0x2b8   :  { %441 = vrot.lane.b32.xlu0 %v365_v45, %s763_s0  ;;  %672 = vmatmul.mubr.f32.vlgmr.msra.gmra.mxu1 %v365_v45 }
 0x32a   :  { %v442_v47 = vpop.permute.xlu0 %441 }
 0x32b   :  { %v444_v48 = vadd.f32 %v442_v47, %v365_v45 }
 0x32d   :  { %v445_v49 = vadd.f32 1e-08, %v444_v48 }
 0x32f   :  { %689 = vrcp.f32 %v445_v49 }
 0x33c   :  { %v690_v50 = vpop.eup %689 }
 0x33d   :  { %v447_v51 = vmul.f32 %v690_v50, %v445_v49 }
 0x33f   :  { %v448_v52 = vsub.f32 2.0, %v447_v51 }
 0x341   :  { %v449_v53 = vmul.f32 %v690_v50, %v448_v52 }
 0x343   :  { %v450_v54 = vmul.f32 %v449_v53, %v365_v45 }
 0x345   :  { %v482_v55 = vadd.f32 -0.5, %v450_v54 }
 0x347   :  { %456 = vperm.xlu0 %684, %v482_v55  }
 0x378   :  { %v436_v56 = vpop.f32.mrf.mxu1 }
 0x379   :  { %v437_v62 = vadd.f32 %v481_v58, %v436_v56 }
 0x37a   :  { %v673_v57 = vpop.f32.mrf.mxu1 }
 0x3c2   :  { %v457_v61 = vpop.permute.xlu0 %456 }
 0x3c3   :  { %v459_v63 = vmul.f32 %v457_v61, %v453_v60 }
 0x3c5   :  { %v460_v1 = vadd.f32 %v459_v63, %v437_v62 }
 0x3c7   :  { %461 = vst [vmem:[#allocation7] sm:$0xff] %v460_v1 }
 0x3c8   :  { %742 = shalt.err (!%p739_p0)
}
 0x3c9   :  { %471 = dma.vmem_to_hbm [thread:$0]  %s469_s21, 128, %s851_s2, [#allocation4]  }
 0x3ca   :  { %755 = dma.done.wait [#allocation4], 128  }
 0x3cb   :  { %756 = vsyncadd [#allocation4], 4294967168 }
 0x3cc   :  { %475 = vsyncpa [#allocation3], 1 }
 0x3cd   :  { %476 = vsyncpa [#allocation6], 1 }
 0x3ce   :  { %477 = vsyncpa [#allocation4], 1 }

</bundles_post_ra>
